<compile_context>
chip_gen: v7x
topology: tpu7x:2x2x1
jax: 0.10.0
libtpu: 0.0.40
codegen_flags: <defaults>
</compile_context>

<pallas_src>
import jax
import jax.numpy as jnp
from jax.experimental import pallas as pl
from jax.experimental.pallas import tpu as pltpu

EPS = 1e-5
LANE = 128


def _round_up(x, m):
    return (x + m - 1) // m * m


def _make_node_decoder_kernel(num_hidden: int, hidden_dim: int):
    """Kernel closure: num_hidden (Linear,ReLU,BN) blocks + final Linear."""

    def kernel(x_ref, w_ref, bn_ref, wf_ref, out_ref):
        x = x_ref[...]                      # (rows, in_pad) f32
        bn = bn_ref[...]                    # (2*num_hidden, H) f32
        for i in range(num_hidden):
            w_full = w_ref[i]               # (in_pad, H)
            # x columns beyond the true in-dim are zero-padded, and so are the
            # matching weight rows, so using the common padded in-dim is exact.
            if x.shape[1] != w_full.shape[0]:
                w_full = w_full[: x.shape[1], :]
            # Linear (bias=False)
            h = jnp.dot(x, w_full, preferred_element_type=jnp.float32)
            # ReLU
            h = jnp.maximum(h, 0.0)
            # BatchNorm1d (training-mode batch stats), folded to scale/shift.
            mean = jnp.mean(h, axis=0, keepdims=True)
            var = jnp.mean((h - mean) ** 2, axis=0, keepdims=True)
            gamma = bn[2 * i : 2 * i + 1, :]
            beta = bn[2 * i + 1 : 2 * i + 2, :]
            scale = gamma * jax.lax.rsqrt(var + EPS)
            shift = beta - mean * scale
            x = h * scale + shift
        # Final Linear (with bias); output lanes padded to a multiple of 128.
        wf_pack = wf_ref[...]               # (H + 1, out_pad)
        w_f = wf_pack[:hidden_dim, :]
        b_f = wf_pack[hidden_dim : hidden_dim + 1, :]
        out_ref[...] = jnp.dot(x, w_f, preferred_element_type=jnp.float32) + b_f

    return kernel


def node_decoder_pallas(x, params, hidden_dim, node_dim):
    """x: (b, n, node_latent_dim) f32.  Returns (b, n, node_dim)."""
    b, n, latent_dim = x.shape
    rows = b * n
    num_hidden = len(params["hidden"])
    H = hidden_dim

    in_dims = [latent_dim] + [H] * (num_hidden - 1)
    in_pad = _round_up(max(in_dims), 8)
    out_pad = _round_up(node_dim, LANE)

    # --- activations: (rows, in_pad), zero-padded feature columns -----------
    x2 = x.reshape(rows, latent_dim).astype(jnp.float32)
    if in_pad != latent_dim:
        x2 = jnp.pad(x2, ((0, 0), (0, in_pad - latent_dim)))

    # --- pack hidden weights into one (num_hidden, in_pad, H) slab ----------
    w_stack = jnp.zeros((num_hidden, in_pad, H), jnp.float32)
    for i, blk in enumerate(params["hidden"]):
        w_stack = w_stack.at[i, : in_dims[i], :].set(blk["w"].astype(jnp.float32))

    # --- pack BN gamma/beta rows into one (2*num_hidden, H) slab ------------
    bn_rows = []
    for blk in params["hidden"]:
        bn_rows.append(blk["gamma"].reshape(1, H).astype(jnp.float32))
        bn_rows.append(blk["beta"].reshape(1, H).astype(jnp.float32))
    bn_pack = jnp.concatenate(bn_rows, axis=0)

    # --- pack final weight + bias, lane-dense padded to out_pad -------------
    wf_pack = jnp.zeros((H + 1, out_pad), jnp.float32)
    wf_pack = wf_pack.at[:H, :node_dim].set(params["final"]["w"].astype(jnp.float32))
    wf_pack = wf_pack.at[H, :node_dim].set(params["final"]["b"].astype(jnp.float32))

    kernel = _make_node_decoder_kernel(num_hidden, H)
    out = pl.pallas_call(
        kernel,
        out_shape=jax.ShapeDtypeStruct((rows, out_pad), jnp.float32),
        in_specs=[pl.BlockSpec(memory_space=pltpu.MemorySpace.VMEM)] * 4,
        out_specs=pl.BlockSpec(memory_space=pltpu.MemorySpace.VMEM),
    )(x2, w_stack, bn_pack, wf_pack)

    return out[:, :node_dim].reshape(b, n, node_dim)


def reference_forward(x, params, hidden_dim, node_dim):
    """Pure-JAX reference matching the torch forward (training-mode BN)."""
    b, n, _ = x.shape
    h = x.reshape(b * n, -1)
    for blk in params["hidden"]:
        h = h @ blk["w"]
        h = jnp.maximum(h, 0.0)
        mean = jnp.mean(h, axis=0, keepdims=True)
        var = jnp.mean((h - mean) ** 2, axis=0, keepdims=True)
        h = (h - mean) / jnp.sqrt(var + EPS) * blk["gamma"] + blk["beta"]
    out = h @ params["final"]["w"] + params["final"]["b"]
    return out.reshape(b, n, node_dim)


if __name__ == "__main__":
    # Module hyper-parameters (small, consistent with __init__).
    NODE_LATENT_DIM = 32
    HIDDEN_DIM = 32
    NODE_DIM = 16
    NUM_LAYERS = 3            # -> 2 (Linear, ReLU, BN) blocks + final Linear
    BATCH = 2
    NODE_CNT = 8

    key = jax.random.PRNGKey(0)
    keys = iter(jax.random.split(key, 16))

    num_hidden = NUM_LAYERS - 1
    params = {"hidden": [], "final": None}
    in_dim = NODE_LATENT_DIM
    for _ in range(num_hidden):
        w = jax.random.uniform(next(keys), (in_dim, HIDDEN_DIM), jnp.float32, -0.2, 0.2)
        # Non-trivial gamma/beta to exercise the BN scale/shift path (fresh
        # torch init would be gamma=1, beta=0; forward semantics identical).
        gamma = jax.random.uniform(next(keys), (HIDDEN_DIM,), jnp.float32, 0.5, 1.5)
        beta = jax.random.uniform(next(keys), (HIDDEN_DIM,), jnp.float32, -0.5, 0.5)
        params["hidden"].append({"w": w, "gamma": gamma, "beta": beta})
        in_dim = HIDDEN_DIM
    w_f = jax.random.uniform(next(keys), (HIDDEN_DIM, NODE_DIM), jnp.float32, -0.2, 0.2)
    b_f = jax.random.uniform(next(keys), (NODE_DIM,), jnp.float32, -0.2, 0.2)
    params["final"] = {"w": w_f, "b": b_f}

    x = jax.random.normal(next(keys), (BATCH, NODE_CNT, NODE_LATENT_DIM), jnp.float32)

    out = node_decoder_pallas(x, params, HIDDEN_DIM, NODE_DIM)
    out = jax.block_until_ready(out)

    ref = reference_forward(x, params, HIDDEN_DIM, NODE_DIM)
    assert out.shape == (BATCH, NODE_CNT, NODE_DIM), out.shape
    err = float(jnp.max(jnp.abs(out - ref)))
    assert jnp.allclose(out, ref, atol=1e-4, rtol=1e-4), err

    print("KERNEL_OK")
</pallas_src>

<mosaic_0001>
module attributes {stable_mosaic.version = 11 : i64} {
  func.func @kernel(%arg0: memref<16x32xf32, #tpu.memory_space<vmem>>, %arg1: memref<2x32x32xf32, #tpu.memory_space<vmem>>, %arg2: memref<4x32xf32, #tpu.memory_space<vmem>>, %arg3: memref<33x128xf32, #tpu.memory_space<vmem>>, %arg4: memref<16x128xf32, #tpu.memory_space<vmem>>) attributes {dimension_semantics = [], scalar_prefetch = 0 : i64, scratch_operands = 0 : i64, tpu.core_type = #tpu.core_type<tc>} {
    %c0 = arith.constant 0 : index
    %c0_0 = arith.constant 0 : index
    %0 = vector.load %arg0[%c0, %c0_0] : memref<16x32xf32, #tpu.memory_space<vmem>>, vector<16x32xf32>
    %c0_1 = arith.constant 0 : index
    %c0_2 = arith.constant 0 : index
    %1 = vector.load %arg2[%c0_1, %c0_2] : memref<4x32xf32, #tpu.memory_space<vmem>>, vector<4x32xf32>
    %c0_3 = arith.constant 0 : index
    %c0_4 = arith.constant 0 : index
    %c0_5 = arith.constant 0 : index
    %2 = vector.load %arg1[%c0_3, %c0_4, %c0_5] : memref<2x32x32xf32, #tpu.memory_space<vmem>>, vector<1x32x32xf32>
    %3 = vector.shape_cast %2 : vector<1x32x32xf32> to vector<32x32xf32>
    %cst = arith.constant dense<0.000000e+00> : vector<16x32xf32>
    %4 = tpu.matmul %0, %3, %cst {dimension_numbers = #tpu.dot_dimension_numbers<[1], [0], [0], [1], [0, 0, 1, 1], [], []>} : vector<16x32xf32>, vector<32x32xf32>, vector<16x32xf32> -> vector<16x32xf32>
    %cst_6 = arith.constant 0.000000e+00 : f32
    %5 = vector.broadcast %cst_6 : f32 to vector<16x32xf32>
    %6 = arith.maximumf %4, %5 : vector<16x32xf32>
    %cst_7 = arith.constant dense<0.000000e+00> : vector<32xf32>
    %7 = vector.multi_reduction <add>, %6, %cst_7 [0] : vector<16x32xf32> to vector<32xf32>
    %8 = vector.shape_cast %7 : vector<32xf32> to vector<1x32xf32>
    %cst_8 = arith.constant 1.600000e+01 : f32
    %9 = vector.broadcast %cst_8 : f32 to vector<1x32xf32>
    %10 = arith.divf %8, %9 : vector<1x32xf32>
    %11 = vector.broadcast %10 : vector<1x32xf32> to vector<16x32xf32>
    %12 = arith.subf %6, %11 : vector<16x32xf32>
    %13 = arith.mulf %12, %12 : vector<16x32xf32>
    %cst_9 = arith.constant dense<0.000000e+00> : vector<32xf32>
    %14 = vector.multi_reduction <add>, %13, %cst_9 [0] : vector<16x32xf32> to vector<32xf32>
    %15 = vector.shape_cast %14 : vector<32xf32> to vector<1x32xf32>
    %cst_10 = arith.constant 1.600000e+01 : f32
    %16 = vector.broadcast %cst_10 : f32 to vector<1x32xf32>
    %17 = arith.divf %15, %16 : vector<1x32xf32>
    %18 = vector.extract_strided_slice %1 {offsets = [0, 0], sizes = [1, 32], strides = [1, 1]} : vector<4x32xf32> to vector<1x32xf32>
    %19 = vector.extract_strided_slice %1 {offsets = [1, 0], sizes = [1, 32], strides = [1, 1]} : vector<4x32xf32> to vector<1x32xf32>
    %cst_11 = arith.constant 9.99999974E-6 : f32
    %20 = vector.broadcast %cst_11 : f32 to vector<1x32xf32>
    %21 = arith.addf %17, %20 : vector<1x32xf32>
    %22 = math.rsqrt %21 : vector<1x32xf32>
    %23 = arith.mulf %18, %22 : vector<1x32xf32>
    %24 = arith.mulf %10, %23 : vector<1x32xf32>
    %25 = arith.subf %19, %24 : vector<1x32xf32>
    %26 = vector.broadcast %23 : vector<1x32xf32> to vector<16x32xf32>
    %27 = arith.mulf %6, %26 : vector<16x32xf32>
    %28 = vector.broadcast %25 : vector<1x32xf32> to vector<16x32xf32>
    %29 = arith.addf %27, %28 : vector<16x32xf32>
    %c1 = arith.constant 1 : index
    %c0_12 = arith.constant 0 : index
    %c0_13 = arith.constant 0 : index
    %30 = vector.load %arg1[%c1, %c0_12, %c0_13] : memref<2x32x32xf32, #tpu.memory_space<vmem>>, vector<1x32x32xf32>
    %31 = vector.shape_cast %30 : vector<1x32x32xf32> to vector<32x32xf32>
    %cst_14 = arith.constant dense<0.000000e+00> : vector<16x32xf32>
    %32 = tpu.matmul %29, %31, %cst_14 {dimension_numbers = #tpu.dot_dimension_numbers<[1], [0], [0], [1], [0, 0, 1, 1], [], []>} : vector<16x32xf32>, vector<32x32xf32>, vector<16x32xf32> -> vector<16x32xf32>
    %cst_15 = arith.constant 0.000000e+00 : f32
    %33 = vector.broadcast %cst_15 : f32 to vector<16x32xf32>
    %34 = arith.maximumf %32, %33 : vector<16x32xf32>
    %cst_16 = arith.constant dense<0.000000e+00> : vector<32xf32>
    %35 = vector.multi_reduction <add>, %34, %cst_16 [0] : vector<16x32xf32> to vector<32xf32>
    %36 = vector.shape_cast %35 : vector<32xf32> to vector<1x32xf32>
    %cst_17 = arith.constant 1.600000e+01 : f32
    %37 = vector.broadcast %cst_17 : f32 to vector<1x32xf32>
    %38 = arith.divf %36, %37 : vector<1x32xf32>
    %39 = vector.broadcast %38 : vector<1x32xf32> to vector<16x32xf32>
    %40 = arith.subf %34, %39 : vector<16x32xf32>
    %41 = arith.mulf %40, %40 : vector<16x32xf32>
    %cst_18 = arith.constant dense<0.000000e+00> : vector<32xf32>
    %42 = vector.multi_reduction <add>, %41, %cst_18 [0] : vector<16x32xf32> to vector<32xf32>
    %43 = vector.shape_cast %42 : vector<32xf32> to vector<1x32xf32>
    %cst_19 = arith.constant 1.600000e+01 : f32
    %44 = vector.broadcast %cst_19 : f32 to vector<1x32xf32>
    %45 = arith.divf %43, %44 : vector<1x32xf32>
    %46 = vector.extract_strided_slice %1 {offsets = [2, 0], sizes = [1, 32], strides = [1, 1]} : vector<4x32xf32> to vector<1x32xf32>
    %47 = vector.extract_strided_slice %1 {offsets = [3, 0], sizes = [1, 32], strides = [1, 1]} : vector<4x32xf32> to vector<1x32xf32>
    %cst_20 = arith.constant 9.99999974E-6 : f32
    %48 = vector.broadcast %cst_20 : f32 to vector<1x32xf32>
    %49 = arith.addf %45, %48 : vector<1x32xf32>
    %50 = math.rsqrt %49 : vector<1x32xf32>
    %51 = arith.mulf %46, %50 : vector<1x32xf32>
    %52 = arith.mulf %38, %51 : vector<1x32xf32>
    %53 = arith.subf %47, %52 : vector<1x32xf32>
    %54 = vector.broadcast %51 : vector<1x32xf32> to vector<16x32xf32>
    %55 = arith.mulf %34, %54 : vector<16x32xf32>
    %56 = vector.broadcast %53 : vector<1x32xf32> to vector<16x32xf32>
    %57 = arith.addf %55, %56 : vector<16x32xf32>
    %c0_21 = arith.constant 0 : index
    %c0_22 = arith.constant 0 : index
    %58 = vector.load %arg3[%c0_21, %c0_22] : memref<33x128xf32, #tpu.memory_space<vmem>>, vector<33x128xf32>
    %59 = vector.extract_strided_slice %58 {offsets = [0, 0], sizes = [32, 128], strides = [1, 1]} : vector<33x128xf32> to vector<32x128xf32>
    %60 = vector.extract_strided_slice %58 {offsets = [32, 0], sizes = [1, 128], strides = [1, 1]} : vector<33x128xf32> to vector<1x128xf32>
    %cst_23 = arith.constant dense<0.000000e+00> : vector<16x128xf32>
    %61 = tpu.matmul %57, %59, %cst_23 {dimension_numbers = #tpu.dot_dimension_numbers<[1], [0], [0], [1], [0, 0, 1, 1], [], []>} : vector<16x32xf32>, vector<32x128xf32>, vector<16x128xf32> -> vector<16x128xf32>
    %62 = vector.broadcast %60 : vector<1x128xf32> to vector<16x128xf32>
    %63 = arith.addf %61, %62 : vector<16x128xf32>
    %c0_24 = arith.constant 0 : index
    %c0_25 = arith.constant 0 : index
    %64 = vector.load %arg4[%c0_24, %c0_25] : memref<16x128xf32, #tpu.memory_space<vmem>>, vector<16x128xf32>
    tpu.vector_store %arg4[%c0_24, %c0_25], %63 {strides = array<i32>} : memref<16x128xf32, #tpu.memory_space<vmem>>, vector<16x128xf32>,
    return
  }
}

</mosaic_0001>

<bundles_post_ra>
// kernel: tpu_custom_call.1
= control target key start
LH: loop header
LB: loop body
LE: loop exit
PB: predicated region body
PF: predicated region fallthrough
CT: control target
= control target key end

     0   :  { %9 = vsyncpa [#allocation3], 0  ;;  %s750_s0 = inlined_call_operand.hbm [shape: f32[16,32], index: 0, kind: input, shape index: {}]   ;;  %s751_s1 = inlined_call_operand.hbm [shape: f32[2,32,32], index: 1, kind: input, shape index: {}]   ;;  %s752_s2 = inlined_call_operand.vmem [shape: f32[4,32], index: 2, kind: input, shape index: {}]   ;;  %s753_s3 = inlined_call_operand.hbm [shape: f32[33,128], index: 3, kind: input, shape index: {}]   ;;  %s754_s4 = inlined_call_operand.hbm [shape: f32[16,128], index: 4, kind: output, shape index: {}]  }
   0x1   :  { %10 = vsyncpa [#allocation6], 0 }
   0x2   :  { %11 = vsyncpa [#allocation4], 0  ;;  %s623_s15 = smov [#allocation5]   ;;  %s624_s17 = smov [#allocation2]  }
   0x3   :  { %s29_s16 = sshll.u32 %s623_s15, 4  ;;  %s17_s18 = sshll.u32 %s624_s17, 4  ;;  %s30_s16 = int_to_ptr.vmem [resolvable:$true] %s29_s16  ;;  %s654_s18 = int_to_ptr.vmem [resolvable:$true] %s17_s18 }
   0x4   :  { %s529_s21 = scalar_lea.hbm %s751_s1, 1024 }
   0x5   :  { %p530_p0 = scmp.ne.s32.totalorder %s751_s1, %s529_s21  ;;  %p533_p1 = scmp.lt.u32.totalorder %s529_s21, %s751_s1 }
   0x7   :  { %p535_p2 = pnand %p533_p1, %p530_p0 }
   0x9   :  { %538 = shalt.err (!%p535_p2)
}
   0xa   :  { %s539_s26 = scalar_lea.vmem %s30_s16, 1024  ;;  %p544_p4 = scmp.lt.s32.totalorder %s30_s16, %s30_s16 }
   0xb   :  { %p540_p3 = scmp.ne.s32.totalorder %s30_s16, %s539_s26  ;;  %p545_p5 = scmp.lt.s32.totalorder %s539_s26, %s539_s26 }
   0xd   :  { %p546_p6 = por %p545_p5, %p544_p4 }
   0xf   :  { %p547_p7 = pnand %p546_p6, %p540_p3 }
  0x11   :  { %550 = shalt.err (!%p547_p7)
}
  0x12   :  { %s625_s27 = smov 128   ;;  %s626_s28 = smov 8  }
  0x13   :  { %35 = dma.hbm_to_vmem [thread:$0]  %s751_s1, 1024, %s30_s16, [#allocation6], %s625_s27, %s625_s27, %s626_s28  }
  0x14   :  { %s551_s7 = scalar_lea.hbm %s750_s0, 256 }
  0x15   :  { %p552_p8 = scmp.ne.s32.totalorder %s750_s0, %s551_s7  ;;  %p555_p9 = scmp.lt.u32.totalorder %s551_s7, %s750_s0 }
  0x17   :  { %p557_p10 = pnand %p555_p9, %p552_p8 }
  0x19   :  { %560 = shalt.err (!%p557_p10)
}
  0x1a   :  { %s561_s12 = scalar_lea.vmem %s654_s18, 256  ;;  %p566_p12 = scmp.lt.s32.totalorder %s654_s18, %s654_s18 }
  0x1b   :  { %p562_p11 = scmp.ne.s32.totalorder %s654_s18, %s561_s12  ;;  %p567_p13 = scmp.lt.s32.totalorder %s561_s12, %s561_s12 }
  0x1d   :  { %p568_p0 = por %p567_p13, %p566_p12 }
  0x1f   :  { %p569_p1 = pnand %p568_p0, %p562_p11 }
  0x21   :  { %572 = shalt.err (!%p569_p1)
}
  0x22   :  { %23 = dma.hbm_to_vmem [thread:$0]  %s750_s0, 256, %s654_s18, [#allocation3], %s625_s27, %s625_s27, %s626_s28  }
  0x23   :  { %s627_s14 = smov [#allocation7]   ;;  %s573_s19 = scalar_lea.hbm %s753_s3, 640 }
  0x24   :  { %s43_s15 = sshll.u32 %s627_s14, 4  ;;  %p574_p2 = scmp.ne.s32.totalorder %s753_s3, %s573_s19  ;;  %s44_s15 = int_to_ptr.vmem [resolvable:$true] %s43_s15 }
  0x25   :  { %p577_p3 = scmp.lt.u32.totalorder %s573_s19, %s753_s3 }
  0x27   :  { %p579_p4 = pnand %p577_p3, %p574_p2 }
  0x29   :  { %582 = shalt.err (!%p579_p4)
}
  0x2a   :  { %s583_s24 = scalar_lea.vmem %s44_s15, 640  ;;  %p588_p6 = scmp.lt.s32.totalorder %s44_s15, %s44_s15 }
  0x2b   :  { %p584_p5 = scmp.ne.s32.totalorder %s44_s15, %s583_s24  ;;  %p589_p7 = scmp.lt.s32.totalorder %s583_s24, %s583_s24 }
  0x2d   :  { %p590_p8 = por %p589_p7, %p588_p6 }
  0x2f   :  { %p591_p9 = pnand %p590_p8, %p584_p5 }
  0x31   :  { %594 = shalt.err (!%p591_p9)
}
  0x32   :  { %49 = dma.hbm_to_vmem [thread:$0]  %s753_s3, 640, %s44_s15, [#allocation6], %s625_s27, %s625_s27, %s626_s28  }
  0x33   :  { %617 = dma.done.wait [#allocation3], 256  }
  0x34   :  { %618 = vsyncadd [#allocation3], 4294967040 }
  0x35   :  { %619 = dma.done.wait [#allocation6], 1664  }
  0x36   :  { %620 = vsyncadd [#allocation6], 4294965632  ;;  %vm66_vm0 = vcmask 261120   ;;  %v62_v0 = vld [vmem:[#allocation5] sm:$0xff]  ;;  %v63_v1 = vld [vmem:[#allocation5 + $0x8] sm:$0xff]  ;;  %v183_v43 = vlaneseq }
  0x37   :  { %v64_v2 = vld [vmem:[#allocation5 + $0x10] sm:$0xff]  ;;  %v495_v3 = vpack.c.bf16 %v63_v1, %v62_v0  ;;  %v65_v4 = vld [vmem:[#allocation5 + $0x18] sm:$0xff]  ;;  %v196_v8 = vld [vmem:[#allocation5 + $0x20] sm:$0xff] }
  0x38   :  { %v59_v5 = vld [vmem:[#allocation2] sm:$0xff]  ;;  %v499_v6 = vpack.c.bf16 %v65_v4, %v64_v2  ;;  %v60_v7 = vld [vmem:[#allocation2 + $0x8] sm:$0xff]  ;;  %v197_v9 = vld [vmem:[#allocation5 + $0x28] sm:$0xff]  ;;  %v712_v44 = vshrl.u32 %v183_v43, 7 }
  0x39   :  { %470 = vmatprep.mubr.msk.f32.mxu0 %vm66_vm0, %v59_v5  ;;  %496 = vmatprep.subr.bf16.mxu0 %v495_v3  ;;  %v198_v10 = vld [vmem:[#allocation5 + $0x30] sm:$0xff]  ;;  %v503_v11 = vpack.c.bf16 %v197_v9, %v196_v8  ;;  %v199_v12 = vld [vmem:[#allocation5 + $0x38] sm:$0xff]  ;;  %v327_v59 = vld [vmem:[#allocation7] sm:$0xff] }
  0x3a   :  { %498 = vmatpush3.bf16.msra.mxu0 %v495_v3  ;;  %v507_v13 = vpack.c.bf16 %v199_v12, %v198_v10  ;;  %v717_v45 = vld [vmem:[%s752_s2] sm:$0xf]  ;;  %v185_v46 = vsub.s32 0, %v712_v44  ;;  %v191_v54 = vsub.s32 1, %v712_v44  ;;  %v328_v60 = vld [vmem:[#allocation7 + $0x8] sm:$0xff]  ;;  %v330_v63 = vld [vmem:[#allocation7 + $0x18] sm:$0xff] }
  0x3b   :  { %500 = vmatprep.subr.bf16.mxu0 %v499_v6  ;;  %504 = vmatprep.subr.bf16.mxu1 %v503_v11  ;;  %v511_v61 = vpack.c.bf16 %v328_v60, %v327_v59  ;;  %v329_v62 = vld [vmem:[#allocation7 + $0x10] sm:$0xff]  ;;  %v441_v43 = vld [vmem:[#allocation7 + $0x20] ss:$0 sm:$0xff]  ;;  %s628_s2 = smov [#allocation8]  }
  0x3c   :  { %506 = vmatpush3.bf16.msra.mxu1 %v503_v11  ;;  %v515_v0 = vpack.c.bf16 %v330_v63, %v329_v62  ;;  %s424_s26 = sshll.u32 %s628_s2, 4  ;;  %s425_s26 = int_to_ptr.vmem [resolvable:$true] %s424_s26 }
  0x3d   :  { %508 = vmatprep.subr.bf16.mxu1 %v507_v13  ;;  %s595_s29 = scalar_lea.vmem %s425_s26, 256  ;;  %p600_p11 = scmp.lt.s32.totalorder %s425_s26, %s425_s26 }
  0x3e   :  { %502 = vmatpush3.bf16.msra.mxu0 %v499_v6  ;;  %p596_p10 = scmp.ne.s32.totalorder %s425_s26, %s595_s29  ;;  %p601_p12 = scmp.lt.s32.totalorder %s595_s29, %s595_s29 }
  0x3f   :  { %512 = vmatprep.subr.bf16.mxu0 %v511_v61 }
  0x40   :  { %510 = vmatpush3.bf16.msra.mxu1 %v507_v13  ;;  %p602_p13 = por %p601_p12, %p600_p11 }
  0x41   :  { %471 = vmatmul.mubr.msk.f32.vlgmr.msra.gmra.mrb[0].mxu0 %vm66_vm0, %v60_v7 }
  0x42   :  { %514 = vmatpush3.bf16.msra.mxu0 %v511_v61  ;;  %p603_p0 = pnand %p602_p13, %p596_p10 }
  0x43   :  { %516 = vmatprep.subr.bf16.mxu0 %v515_v0 }
  0x46   :  { %518 = vmatpush3.bf16.msra.mxu0 %v515_v0 }
 0x114   :  { %v472_v14 = vpop.f32.mrb[0].mxu0 }
 0x115   :  { %v149_v15 = vmax.f32 %v472_v14, 0.0  ;;  %v139_v16 = vpop.f32.mrb[1].mxu0 }
 0x116   :  { %v148_v17 = vmax.f32 %v139_v16, 0.0 }
 0x117   :  { %v151_v18 = vsel %vm66_vm0, %v149_v15, 0.0 }
 0x118   :  { %v150_v19 = vsel %vm66_vm0, %v148_v17, 0.0 }
 0x119   :  { %v152_v20 = vadd.f32 %v151_v18, %v150_v19 }
 0x11b   :  { %v153_v21 = vrot.slane %v152_v20, 4 }
 0x11d   :  { %v154_v22 = vadd.f32 %v153_v21, %v152_v20 }
 0x11f   :  { %v155_v23 = vrot.slane %v154_v22, 2 }
 0x121   :  { %v156_v24 = vadd.f32 %v155_v23, %v154_v22 }
 0x123   :  { %v157_v25 = vrot.slane %v156_v24, 1 }
 0x125   :  { %v158_v26 = vadd.f32 %v157_v25, %v156_v24 }
 0x127   :  { %v160_v27 = vmul.f32 0.0625, %v158_v26 }
 0x129   :  { %v161_v28 = vsub.f32 %v148_v17, %v160_v27  ;;  %v162_v29 = vsub.f32 %v149_v15, %v160_v27 }
 0x12b   :  { %v163_v30 = vmul.f32 %v161_v28, %v161_v28  ;;  %v164_v31 = vmul.f32 %v162_v29, %v162_v29 }
 0x12d   :  { %v165_v32 = vsel %vm66_vm0, %v163_v30, 0.0  ;;  %v166_v33 = vsel %vm66_vm0, %v164_v31, 0.0  ;;  %v317_v30 = vsub.s32 2, %v712_v44 }
 0x12e   :  { %v167_v34 = vadd.f32 %v166_v33, %v165_v32 }
 0x130   :  { %v168_v35 = vrot.slane %v167_v34, 4 }
 0x132   :  { %v169_v36 = vadd.f32 %v168_v35, %v167_v34 }
 0x134   :  { %v170_v37 = vrot.slane %v169_v36, 2 }
 0x136   :  { %v171_v38 = vadd.f32 %v170_v37, %v169_v36 }
 0x138   :  { %v172_v39 = vrot.slane %v171_v38, 1 }
 0x13a   :  { %v173_v40 = vadd.f32 %v172_v39, %v171_v38  ;;  %v323_v38 = vsub.s32 3, %v712_v44 }
 0x13c   :  { %v174_v41 = vmul.f32 0.0625, %v173_v40 }
 0x13e   :  { %v175_v42 = vadd.f32 1e-05, %v174_v41 }
 0x140   :  { %525 = vrsqrt.f32 %v175_v42 }
 0x14a   :  { %v526_v47 = vpop.eup %525 }
 0x14b   :  { %v177_v48 = vmul.f32 %v526_v47, %v717_v45 }
 0x14d   :  { %v178_v49 = vmul.f32 %v177_v48, %v160_v27  ;;  %v186_v50 = vrot.slane %v177_v48, %v185_v46 }
 0x14f   :  { %v180_v51 = vrot.slane %v178_v49, 7  ;;  %v187_v52 = vmul.f32 %v186_v50, %v148_v17  ;;  %v188_v53 = vmul.f32 %v186_v50, %v149_v15 }
 0x151   :  { %v182_v55 = vsub.f32 %v717_v45, %v180_v51 }
 0x153   :  { %v192_v56 = vrot.slane %v182_v55, %v191_v54 }
 0x155   :  { %v193_v57 = vadd.f32 %v192_v56, %v187_v52  ;;  %v194_v58 = vadd.f32 %v192_v56, %v188_v53 }
 0x157   :  { %481 = vmatprep.mubr.msk.f32.mxu1 %vm66_vm0, %v193_v57 }
 0x158   :  { %482 = vmatmul.mubr.msk.f32.vlgmr.msra.gmra.mrb[0].mxu1 %vm66_vm0, %v194_v58 }
 0x22b   :  { %v483_v1 = vpop.f32.mrb[0].mxu1 }
 0x22c   :  { %v282_v2 = vmax.f32 %v483_v1, 0.0  ;;  %v272_v3 = vpop.f32.mrb[1].mxu1 }
 0x22d   :  { %v281_v4 = vmax.f32 %v272_v3, 0.0 }
 0x22e   :  { %v284_v5 = vsel %vm66_vm0, %v282_v2, 0.0 }
 0x22f   :  { %v283_v6 = vsel %vm66_vm0, %v281_v4, 0.0 }
 0x230   :  { %v285_v7 = vadd.f32 %v284_v5, %v283_v6 }
 0x232   :  { %v286_v8 = vrot.slane %v285_v7, 4 }
 0x234   :  { %v287_v9 = vadd.f32 %v286_v8, %v285_v7 }
 0x236   :  { %v288_v10 = vrot.slane %v287_v9, 2 }
 0x238   :  { %v289_v11 = vadd.f32 %v288_v10, %v287_v9 }
 0x23a   :  { %v290_v12 = vrot.slane %v289_v11, 1 }
 0x23c   :  { %v291_v13 = vadd.f32 %v290_v12, %v289_v11 }
 0x23e   :  { %v292_v14 = vmul.f32 0.0625, %v291_v13 }
 0x240   :  { %v293_v15 = vsub.f32 %v281_v4, %v292_v14  ;;  %v294_v16 = vsub.f32 %v282_v2, %v292_v14 }
 0x242   :  { %v295_v17 = vmul.f32 %v293_v15, %v293_v15  ;;  %v296_v18 = vmul.f32 %v294_v16, %v294_v16 }
 0x244   :  { %v297_v19 = vsel %vm66_vm0, %v295_v17, 0.0  ;;  %v298_v20 = vsel %vm66_vm0, %v296_v18, 0.0 }
 0x245   :  { %v299_v21 = vadd.f32 %v298_v20, %v297_v19 }
 0x247   :  { %v300_v22 = vrot.slane %v299_v21, 4 }
 0x249   :  { %v301_v23 = vadd.f32 %v300_v22, %v299_v21 }
 0x24b   :  { %v302_v24 = vrot.slane %v301_v23, 2 }
 0x24d   :  { %v303_v25 = vadd.f32 %v302_v24, %v301_v23 }
 0x24f   :  { %v304_v26 = vrot.slane %v303_v25, 1 }
 0x251   :  { %v305_v27 = vadd.f32 %v304_v26, %v303_v25 }
 0x253   :  { %v306_v28 = vmul.f32 0.0625, %v305_v27 }
 0x255   :  { %v307_v29 = vadd.f32 1e-05, %v306_v28 }
 0x257   :  { %527 = vrsqrt.f32 %v307_v29 }
 0x261   :  { %v528_v31 = vpop.eup %527 }
 0x262   :  { %v309_v32 = vmul.f32 %v528_v31, %v717_v45 }
 0x264   :  { %v310_v33 = vmul.f32 %v309_v32, %v292_v14  ;;  %v318_v34 = vrot.slane %v309_v32, %v317_v30 }
 0x266   :  { %v312_v35 = vrot.slane %v310_v33, 7  ;;  %v319_v36 = vmul.f32 %v318_v34, %v281_v4  ;;  %v320_v37 = vmul.f32 %v318_v34, %v282_v2 }
 0x268   :  { %v314_v39 = vsub.f32 %v717_v45, %v312_v35 }
 0x26a   :  { %v324_v40 = vrot.slane %v314_v39, %v323_v38 }
 0x26c   :  { %v325_v41 = vadd.f32 %v324_v40, %v319_v36  ;;  %v326_v42 = vadd.f32 %v324_v40, %v320_v37 }
 0x26e   :  { %492 = vmatprep.mubr.msk.f32.mxu0 %vm66_vm0, %v325_v41 }
 0x26f   :  { %493 = vmatmul.mubr.msk.f32.vlgmr.msra.gmra.mrb[2].mxu0 %vm66_vm0, %v326_v42 }
 0x342   :  { %v494_v46 = vpop.f32.mrb[2].mxu0 }
 0x343   :  { %v414_v47 = vadd.f32 %v494_v46, %v441_v43  ;;  %v408_v48 = vpop.f32.mrb[3].mxu0 }
 0x344   :  { %v409_v49 = vadd.f32 %v441_v43, %v408_v48 }
 0x345   :  { %418 = vst [vmem:[#allocation8 + $0x8] sm:$0xff] %v414_v47 }
 0x346   :  { %417 = vst [vmem:[#allocation8] sm:$0xff] %v409_v49 }
 0x347   :  { %606 = shalt.err (!%p603_p0)
}
 0x348   :  { %s607_s6 = scalar_lea.hbm %s754_s4, 256 }
 0x349   :  { %p608_p1 = scmp.ne.s32.totalorder %s754_s4, %s607_s6  ;;  %p611_p2 = scmp.lt.u32.totalorder %s607_s6, %s754_s4 }
 0x34b   :  { %p613_p3 = pnand %p611_p2, %p608_p1 }
 0x34d   :  { %616 = shalt.err (!%p613_p3)
}
 0x34e   :  { %430 = dma.vmem_to_hbm [thread:$0]  %s425_s26, 256, %s754_s4, [#allocation4], %s625_s27, %s625_s27, %s626_s28  }
 0x34f   :  { %621 = dma.done.wait [#allocation4], 256  }
 0x350   :  { %622 = vsyncadd [#allocation4], 4294967040 }
 0x351   :  { %434 = vsyncpa [#allocation3], 1 }
 0x352   :  { %435 = vsyncpa [#allocation6], 1 }
 0x353   :  { %436 = vsyncpa [#allocation4], 1 }

</bundles_post_ra>
